<compile_context>
chip_gen: v7x
topology: tpu7x:2x2x1
jax: 0.10.0
libtpu: 0.0.40
codegen_flags: <defaults>
</compile_context>

<pallas_src>
import jax
import jax.numpy as jnp
from jax.experimental import pallas as pl
from jax.experimental.pallas import tpu as pltpu


def _round_up(n, m):
    return ((n + m - 1) // m) * m


def _num_parallel_cores():
    """Best-effort TensorCore count: 2 on v7x-class chips, else 1."""
    try:
        kind = jax.devices()[0].device_kind.lower()
        if "v7" in kind or "7x" in kind:
            return 2
    except Exception:
        pass
    return 1


def _qvalue_kernel(xa_ref, w1_ref, b1_ref, w2_ref, b2_ref, w3_ref, b3_ref,
                   o_ref):
    """One batch tile; batch-on-lanes: every intermediate is [features, TB]."""
    cdt = w1_ref.dtype  # MXU operand dtype (bf16 by default); f32 accumulation.

    xa = xa_ref[...].astype(cdt)                                    # [S+A, TB]

    # --- layer 1: h1[H, TB] = W1[H, S+A] @ xa ------------------------------
    h1 = jnp.dot(w1_ref[...], xa, preferred_element_type=jnp.float32)
    h1 = jnp.maximum(h1 + b1_ref[...], 0.0)                         # f32 VPU

    # --- layer 2: h2[H1, TB] = W2[H1, H] @ h1 ------------------------------
    h2 = jnp.dot(w2_ref[...], h1.astype(cdt),
                 preferred_element_type=jnp.float32)
    h2 = jnp.maximum(h2 + b2_ref[...], 0.0)

    # --- output layer: W3 is padded to 8 rows (row 0 real, rest zero) -------
    q = jnp.dot(w3_ref[...], h2.astype(cdt),
                preferred_element_type=jnp.float32)                 # [8, TB]
    o_ref[...] = (q[0:1, :] + b3_ref[0, 0]).astype(o_ref.dtype)     # [1, TB]


def qvalue_net_continuous(x, a, params, *, tb_max=2048, min_grid_steps=None):
    """Pallas forward of QValueNetContinuous.

    x: [B, state_dim] f32, a: [B, action_dim] f32.
    params (see init_params): w1 [H,S+A], w2 [H1,H], w3p [8,H1] (bf16 default);
                              b1 [H,1], b2 [H1,1] f32; b3 [1,1] f32 (SMEM).
    Returns [B, 1] float32.
    """
    B, S = x.shape
    A = a.shape[1]
    H = params["w1"].shape[0]
    H1 = params["w2"].shape[0]

    # Feature-major activations (batch on the lane axis). This is the fused
    # torch.cat([x, a], dim=1) in transposed form; one tiny XLA copy.
    xa_t = jnp.concatenate([x.T, a.T], axis=0)                      # [S+A, B]

    if min_grid_steps is None:
        min_grid_steps = _num_parallel_cores()
    n_steps = max(1, -(-B // tb_max))
    if B >= 128 * min_grid_steps:      # only split tiny batches if they fill lanes
        n_steps = max(n_steps, min_grid_steps)

    if n_steps == 1:                   # whole batch in one block: zero padding
        tb, b_pad = B, B
    else:                              # lane-aligned tiles, minimal padding
        tb = _round_up(-(-B // n_steps), 128)
        b_pad = n_steps * tb
    if b_pad != B:
        xa_t = jnp.pad(xa_t, ((0, 0), (0, b_pad - B)))
    grid = (b_pad // tb,)

    def resident(arr):  # whole array, same block every step -> stays in VMEM
        return pl.BlockSpec(arr.shape, lambda i: (0, 0))

    args = (xa_t, params["w1"], params["b1"], params["w2"], params["b2"],
            params["w3p"], params["b3"])

    flops = 2 * b_pad * ((S + A) * H + H * H1 + H1)
    weight_bytes = sum(int(p.size) * p.dtype.itemsize for p in args[1:])
    bytes_accessed = weight_bytes + b_pad * (S + A) * 4 + b_pad * 4

    out_row = pl.pallas_call(
        _qvalue_kernel,
        out_shape=jax.ShapeDtypeStruct((1, b_pad), jnp.float32),
        grid_spec=pltpu.PrefetchScalarGridSpec(
            num_scalar_prefetch=0,
            grid=grid,
            in_specs=[
                pl.BlockSpec((S + A, tb), lambda i: (0, i)),  # streamed acts
                resident(params["w1"]),
                resident(params["b1"]),
                resident(params["w2"]),
                resident(params["b2"]),
                resident(params["w3p"]),
                pl.BlockSpec(memory_space=pltpu.MemorySpace.SMEM),  # b3 scalar
            ],
            out_specs=pl.BlockSpec((1, tb), lambda i: (0, i)),
        ),
        compiler_params=pltpu.CompilerParams(
            dimension_semantics=("parallel",)),
        cost_estimate=pl.CostEstimate(flops=flops, transcendentals=0,
                                      bytes_accessed=bytes_accessed),
    )(*args)

    return out_row[0, :B].reshape(B, 1)


def init_params(key, state_dim, hidden_dim, hidden_dim1, action_dim,
                weights_dtype=jnp.bfloat16):
    """PyTorch-Linear-style init, uniform(-1/sqrt(fan_in), +1/sqrt(fan_in)).

    Weights keep PyTorch's [out, in] layout (batch-on-lanes needs no
    transpose); biases are [out, 1] f32 so they broadcast over the lane axis.
    Use weights_dtype=jnp.float32 for exact fp32 math.
    """
    def linear(k, fan_in, fan_out):
        kw, kb = jax.random.split(k)
        bound = 1.0 / jnp.sqrt(float(fan_in))
        w = jax.random.uniform(kw, (fan_out, fan_in), jnp.float32, -bound, bound)
        b = jax.random.uniform(kb, (fan_out, 1), jnp.float32, -bound, bound)
        return w, b

    k1, k2, k3 = jax.random.split(key, 3)
    w1, b1 = linear(k1, state_dim + action_dim, hidden_dim)   # [H, S+A]
    w2, b2 = linear(k2, hidden_dim, hidden_dim1)              # [H1, H]
    w3, b3 = linear(k3, hidden_dim1, 1)                       # [1, H1]
    w3p = jnp.zeros((8, hidden_dim1), jnp.float32).at[0:1].set(w3)
    return {
        "w1": w1.astype(weights_dtype),    # [H, S+A]
        "b1": b1,                          # [H, 1]  f32
        "w2": w2.astype(weights_dtype),    # [H1, H]
        "b2": b2,                          # [H1, 1] f32
        "w3p": w3p.astype(weights_dtype),  # [8, H1] row 0 = fc_out.weight
        "b3": b3.reshape(1, 1),            # [1, 1]  f32 (SMEM scalar)
    }


def reference_forward(x, a, p):
    """Plain-JAX forward in the original torch.cat orientation, with the same
    operand-dtype / f32-accumulate math as the kernel."""
    cdt = p["w1"].dtype
    xa = jnp.concatenate([x, a], axis=1).astype(cdt)
    h1 = jnp.maximum(
        jnp.dot(xa, p["w1"].T, preferred_element_type=jnp.float32)
        + p["b1"].T, 0.0)
    h2 = jnp.maximum(
        jnp.dot(h1.astype(cdt), p["w2"].T, preferred_element_type=jnp.float32)
        + p["b2"].T, 0.0)
    q = jnp.dot(h2.astype(cdt), p["w3p"][0:1].T,
                preferred_element_type=jnp.float32)
    return q + p["b3"]                                               # [B, 1]


if __name__ == "__main__":
    state_dim, action_dim = 12, 4
    hidden_dim, hidden_dim1 = 64, 64

    root = jax.random.PRNGKey(0)
    kp, kx, ka = jax.random.split(root, 3)

    # (batch, tb_max): tiny single block, odd-size single block, mid single
    # block, and a forced multi-step grid with lane-tile padding.
    cases = [(8, 2048), (37, 2048), (384, 2048), (200, 128)]

    for weights_dtype, tol in ((jnp.bfloat16, 2e-3), (jnp.float32, 1e-4)):
        params = init_params(kp, state_dim, hidden_dim, hidden_dim1, action_dim,
                             weights_dtype=weights_dtype)
        for batch, tb_max in cases:
            kxb = jax.random.fold_in(kx, batch)
            kab = jax.random.fold_in(ka, batch)
            x = jax.random.normal(kxb, (batch, state_dim), jnp.float32)
            a = jax.random.normal(kab, (batch, action_dim), jnp.float32)

            out = qvalue_net_continuous(x, a, params, tb_max=tb_max)
            jax.block_until_ready(out)

            ref = reference_forward(x, a, params)
            assert out.shape == (batch, 1), out.shape
            err = float(jnp.max(jnp.abs(out - ref)))
            assert jnp.allclose(out, ref, atol=tol, rtol=tol), (
                f"dtype={weights_dtype.__name__} batch={batch} "
                f"max abs err={err}")

    print("KERNEL_OK")
</pallas_src>

<mosaic_0001>
module attributes {stable_mosaic.version = 11 : i64} {
  func.func @_qvalue_kernel(%arg0: i32, %arg1: memref<16x8xf32, #tpu.memory_space<vmem>>, %arg2: memref<64x16xbf16, #tpu.memory_space<vmem>>, %arg3: memref<64x1xf32, #tpu.memory_space<vmem>>, %arg4: memref<64x64xbf16, #tpu.memory_space<vmem>>, %arg5: memref<64x1xf32, #tpu.memory_space<vmem>>, %arg6: memref<8x64xbf16, #tpu.memory_space<vmem>>, %arg7: memref<1x1xf32, #tpu.memory_space<smem>>, %arg8: memref<1x8xf32, #tpu.memory_space<vmem>>) attributes {dimension_semantics = [#tpu.dimension_semantics<parallel>], iteration_bounds = array<i64: 1>, scalar_prefetch = 0 : i64, scratch_operands = 0 : i64, tpu.core_type = #tpu.core_type<tc>, window_params = [{transform_indices = @transform_0, window_bounds = array<i64: 16, 8>}, {pipeline_mode = #tpu.pipeline_mode<synchronous>, transform_indices = @transform_1, window_bounds = array<i64: 64, 16>}, {pipeline_mode = #tpu.pipeline_mode<synchronous>, transform_indices = @transform_2, window_bounds = array<i64: 64, 1>}, {pipeline_mode = #tpu.pipeline_mode<synchronous>, transform_indices = @transform_3, window_bounds = array<i64: 64, 64>}, {pipeline_mode = #tpu.pipeline_mode<synchronous>, transform_indices = @transform_4, window_bounds = array<i64: 64, 1>}, {pipeline_mode = #tpu.pipeline_mode<synchronous>, transform_indices = @transform_5, window_bounds = array<i64: 8, 64>}, {transform_indices = @transform_6, window_bounds = array<i64: 1, 1>}, {transform_indices = @transform_7, window_bounds = array<i64: 1, 8>}]} {
    %c0 = arith.constant 0 : index
    %c0_0 = arith.constant 0 : index
    %0 = vector.load %arg1[%c0, %c0_0] : memref<16x8xf32, #tpu.memory_space<vmem>>, vector<16x8xf32>
    %1 = arith.truncf %0 : vector<16x8xf32> to vector<16x8xbf16>
    %c0_1 = arith.constant 0 : index
    %c0_2 = arith.constant 0 : index
    %2 = vector.load %arg2[%c0_1, %c0_2] : memref<64x16xbf16, #tpu.memory_space<vmem>>, vector<64x16xbf16>
    %cst = arith.constant dense<0.000000e+00> : vector<64x8xf32>
    %3 = tpu.matmul %2, %1, %cst {dimension_numbers = #tpu.dot_dimension_numbers<[1], [0], [0], [1], [0, 0, 1, 1], [], []>} : vector<64x16xbf16>, vector<16x8xbf16>, vector<64x8xf32> -> vector<64x8xf32>
    %c0_3 = arith.constant 0 : index
    %c0_4 = arith.constant 0 : index
    %4 = vector.load %arg3[%c0_3, %c0_4] : memref<64x1xf32, #tpu.memory_space<vmem>>, vector<64x1xf32>
    %5 = vector.broadcast %4 : vector<64x1xf32> to vector<64x8xf32>
    %6 = arith.addf %3, %5 : vector<64x8xf32>
    %cst_5 = arith.constant 0.000000e+00 : f32
    %7 = vector.broadcast %cst_5 : f32 to vector<64x8xf32>
    %8 = arith.maximumf %6, %7 : vector<64x8xf32>
    %c0_6 = arith.constant 0 : index
    %c0_7 = arith.constant 0 : index
    %9 = vector.load %arg4[%c0_6, %c0_7] : memref<64x64xbf16, #tpu.memory_space<vmem>>, vector<64x64xbf16>
    %10 = arith.truncf %8 : vector<64x8xf32> to vector<64x8xbf16>
    %cst_8 = arith.constant dense<0.000000e+00> : vector<64x8xf32>
    %11 = tpu.matmul %9, %10, %cst_8 {dimension_numbers = #tpu.dot_dimension_numbers<[1], [0], [0], [1], [0, 0, 1, 1], [], []>} : vector<64x64xbf16>, vector<64x8xbf16>, vector<64x8xf32> -> vector<64x8xf32>
    %c0_9 = arith.constant 0 : index
    %c0_10 = arith.constant 0 : index
    %12 = vector.load %arg5[%c0_9, %c0_10] : memref<64x1xf32, #tpu.memory_space<vmem>>, vector<64x1xf32>
    %13 = vector.broadcast %12 : vector<64x1xf32> to vector<64x8xf32>
    %14 = arith.addf %11, %13 : vector<64x8xf32>
    %cst_11 = arith.constant 0.000000e+00 : f32
    %15 = vector.broadcast %cst_11 : f32 to vector<64x8xf32>
    %16 = arith.maximumf %14, %15 : vector<64x8xf32>
    %c0_12 = arith.constant 0 : index
    %c0_13 = arith.constant 0 : index
    %17 = vector.load %arg6[%c0_12, %c0_13] : memref<8x64xbf16, #tpu.memory_space<vmem>>, vector<8x64xbf16>
    %18 = arith.truncf %16 : vector<64x8xf32> to vector<64x8xbf16>
    %cst_14 = arith.constant dense<0.000000e+00> : vector<8x8xf32>
    %19 = tpu.matmul %17, %18, %cst_14 {dimension_numbers = #tpu.dot_dimension_numbers<[1], [0], [0], [1], [0, 0, 1, 1], [], []>} : vector<8x64xbf16>, vector<64x8xbf16>, vector<8x8xf32> -> vector<8x8xf32>
    %20 = vector.extract_strided_slice %19 {offsets = [0, 0], sizes = [1, 8], strides = [1, 1]} : vector<8x8xf32> to vector<1x8xf32>
    %c0_15 = arith.constant 0 : index
    %c0_16 = arith.constant 0 : index
    %21 = memref.load %arg7[%c0_15, %c0_16] : memref<1x1xf32, #tpu.memory_space<smem>>
    %22 = vector.broadcast %21 : f32 to vector<1x8xf32>
    %23 = arith.addf %20, %22 : vector<1x8xf32>
    %c0_17 = arith.constant 0 : index
    %c0_18 = arith.constant 0 : index
    %24 = vector.load %arg8[%c0_17, %c0_18] : memref<1x8xf32, #tpu.memory_space<vmem>>, vector<1x8xf32>
    tpu.vector_store %arg8[%c0_17, %c0_18], %23 {strides = array<i32>} : memref<1x8xf32, #tpu.memory_space<vmem>>, vector<1x8xf32>,
    return
  }
  func.func @transform_0(%arg0: i32) -> (i32, i32) {
    %c0_i32 = arith.constant 0 : i32
    %c0_i32_0 = arith.constant 0 : i32
    return %c0_i32, %arg0 : i32, i32
  }
  func.func @transform_1(%arg0: i32) -> (i32, i32) {
    %c0_i32 = arith.constant 0 : i32
    %c0_i32_0 = arith.constant 0 : i32
    %c0_i32_1 = arith.constant 0 : i32
    return %c0_i32, %c0_i32_0 : i32, i32
  }
  func.func @transform_2(%arg0: i32) -> (i32, i32) {
    %c0_i32 = arith.constant 0 : i32
    %c0_i32_0 = arith.constant 0 : i32
    %c0_i32_1 = arith.constant 0 : i32
    return %c0_i32, %c0_i32_0 : i32, i32
  }
  func.func @transform_3(%arg0: i32) -> (i32, i32) {
    %c0_i32 = arith.constant 0 : i32
    %c0_i32_0 = arith.constant 0 : i32
    %c0_i32_1 = arith.constant 0 : i32
    return %c0_i32, %c0_i32_0 : i32, i32
  }
  func.func @transform_4(%arg0: i32) -> (i32, i32) {
    %c0_i32 = arith.constant 0 : i32
    %c0_i32_0 = arith.constant 0 : i32
    %c0_i32_1 = arith.constant 0 : i32
    return %c0_i32, %c0_i32_0 : i32, i32
  }
  func.func @transform_5(%arg0: i32) -> (i32, i32) {
    %c0_i32 = arith.constant 0 : i32
    %c0_i32_0 = arith.constant 0 : i32
    %c0_i32_1 = arith.constant 0 : i32
    return %c0_i32, %c0_i32_0 : i32, i32
  }
  func.func @transform_6(%arg0: i32) -> (i32, i32) {
    %c0_i32 = arith.constant 0 : i32
    %c0_i32_0 = arith.constant 0 : i32
    %c0_i32_1 = arith.constant 0 : i32
    return %c0_i32, %c0_i32_0 : i32, i32
  }
  func.func @transform_7(%arg0: i32) -> (i32, i32) {
    %c0_i32 = arith.constant 0 : i32
    %c0_i32_0 = arith.constant 0 : i32
    return %c0_i32, %arg0 : i32, i32
  }
}

</mosaic_0001>

<bundles_post_ra>
// kernel: tpu_custom_call.1
= control target key start
LH: loop header
LB: loop body
LE: loop exit
PB: predicated region body
PF: predicated region fallthrough
CT: control target
= control target key end

     0   :  { %vm108_vm0 = vcmask 130048   ;;  %v538_v4 = vmov 0   ;;  %s687_s0 = inlined_call_operand.vmem [shape: f32[16,8], index: 0, kind: input, shape index: {}]   ;;  %s688_s1 = inlined_call_operand.vmem [shape: bf16[64,16], index: 1, kind: input, shape index: {}]   ;;  %s689_s2 = inlined_call_operand.vmem [shape: f32[64,1], index: 2, kind: input, shape index: {}]   ;;  %s690_s3 = inlined_call_operand.vmem [shape: bf16[64,64], index: 3, kind: input, shape index: {}]   ;;  %s691_s4 = inlined_call_operand.vmem [shape: f32[64,1], index: 4, kind: input, shape index: {}]   ;;  %s692_s5 = inlined_call_operand.vmem [shape: bf16[8,64], index: 5, kind: input, shape index: {}]   ;;  %s693_s6 = inlined_call_operand.<no memory space> [shape: f32[1,1], index: 6, kind: input, shape index: {}]   ;;  %s694_s7 = inlined_call_operand.hbm [shape: f32[1,8], index: 7, kind: output, shape index: {}]  }
   0x1   :  { %v29_v0 = vld [vmem:[%s687_s0] sm:$0xff]  ;;  %v30_v1 = vld [vmem:[%s687_s0 + $0x8] sm:$0xff]  ;;  %504 = vset.pattern.permute.xlu0 %v538_v4  ;;  %505 = vset.pattern.permute.xlu1 %v538_v4  ;;  %v508_v6 = vld [vmem:[%s688_s1 + $0x10] sm:$0xff]  }
   0x2   :  { %v31_v2 = vpack.c.bf16 %v30_v1, %v29_v0  ;;  %v506_v3 = vld [vmem:[%s688_s1] sm:$0xff]   ;;  %v507_v5 = vld [vmem:[%s688_s1 + $0x8] sm:$0xff]   ;;  %v42_v8 = vld [vmem:[%s689_s2 + $0x10] sm:$0xff] }
   0x3   :  { %464 = vmatprep.mubr.msk.bf16.mxu0 %vm108_vm0, %v506_v3  ;;  %v40_v7 = vld [vmem:[%s689_s2] sm:$0xff]  ;;  %60 = vperm.xlu1 %505, %v42_v8   ;;  %v41_v9 = vld [vmem:[%s689_s2 + $0x8] sm:$0xff]  ;;  %v43_v10 = vld [vmem:[%s689_s2 + $0x18] sm:$0xff] }
   0x4   :  { %462 = vmatprep.subr.bf16.mxu0 %v31_v2  ;;  %50 = vperm.xlu0 %504, %v40_v7   ;;  %v509_v11 = vld [vmem:[%s688_s1 + $0x18] sm:$0xff]   ;;  %v44_v12 = vld [vmem:[%s689_s2 + $0x20] sm:$0xff]  ;;  %v45_v13 = vld [vmem:[%s689_s2 + $0x28] sm:$0xff] }
   0x5   :  { %463 = vmatpush3.bf16.msra.mxu0 %v31_v2 }
   0x7   :  { %65 = vperm.xlu1 %505, %v43_v10  }
   0x8   :  { %465 = vmatmul.mubr.msk.bf16.vlgmr.msra.gmra.mrb[0].mxu0 %vm108_vm0, %v507_v5  ;;  %55 = vperm.xlu0 %504, %v41_v9  }
   0x9   :  { %468 = vmatprep.mubr.msk.bf16.mxu0 %vm108_vm0, %v508_v6 }
   0xa   :  { %13 = vsyncpa [#allocation4], 0  ;;  %v46_v14 = vld [vmem:[%s689_s2 + $0x30] sm:$0xff]  ;;  %v47_v15 = vld [vmem:[%s689_s2 + $0x38] sm:$0xff]  ;;  %vm274_vm1 = vcmask 523264   ;;  %v539_v0 = vmov 0.0  }
   0xb   :  { %75 = vperm.xlu1 %505, %v45_v13   ;;  %v206_v16 = vld [vmem:[%s691_s4] sm:$0xff]  ;;  %v207_v17 = vld [vmem:[%s691_s4 + $0x8] sm:$0xff]  ;;  %v208_v18 = vld [vmem:[%s691_s4 + $0x10] sm:$0xff]  ;;  %488 = vmatprep.subr.bf16.mxu0 %v539_v0  ;;  %vm540_vm2 = vmmov 0   ;;  %s541_s27 = smov [#allocation3]   ;;  %vm411_vm3 = vcmask 57344  }
   0xc   :  { %70 = vperm.xlu0 %504, %v44_v12   ;;  %v209_v19 = vld [vmem:[%s691_s4 + $0x18] sm:$0xff]  ;;  %v210_v20 = vld [vmem:[%s691_s4 + $0x20] sm:$0xff]  ;;  %v211_v21 = vld [vmem:[%s691_s4 + $0x28] sm:$0xff]  ;;  %s419_s28 = sshll.u32 %s541_s27, 4  ;;  %s420_s28 = int_to_ptr.vmem [resolvable:$true] %s419_s28 }
   0xd   :  { %v212_v22 = vld [vmem:[%s691_s4 + $0x30] sm:$0xff]  ;;  %v213_v23 = vld [vmem:[%s691_s4 + $0x38] sm:$0xff]  ;;  %v510_v24 = vld [vmem:[%s690_s3] sm:$0xff]   ;;  %s514_s29 = scalar_lea.vmem %s420_s28, 16  ;;  %s518_s30 = scalar_lea.vmem %s420_s28, 32 }
   0xe   :  { %480 = vmatprep.mubr.msk.bf16.mxu1 %vm274_vm1, %v510_v24  ;;  %v511_v61 = vld [vmem:[%s690_s3 + $0x8] sm:$0xff]   ;;  %v512_v62 = vld [vmem:[%s690_s3 + $0x10] sm:$0xff]   ;;  %v513_v63 = vld [vmem:[%s690_s3 + $0x18] sm:$0xff]   ;;  %p515_p0 = scmp.ne.s32.totalorder %s420_s28, %s514_s29  ;;  %p519_p1 = scmp.lt.s32.totalorder %s420_s28, %s420_s28 }
   0xf   :  { %85 = vperm.xlu1 %505, %v47_v15   ;;  %p520_p2 = scmp.lt.s32.totalorder %s518_s30, %s514_s29 }
  0x10   :  { %469 = vmatmul.mubr.msk.bf16.gmra.mrb[4].mxu0 %vm108_vm0, %v509_v11  ;;  %80 = vperm.xlu0 %504, %v46_v14  }
  0x11   :  { %496 = vmatprep.mubr.msk.bf16.mxu0 %vm540_vm2, %v539_v0  ;;  %p521_p3 = por %p520_p2, %p519_p1 }
  0x13   :  { %221 = vperm.xlu1 %505, %v207_v17   ;;  %p522_p4 = pnand %p521_p3, %p515_p0 }
  0x14   :  { %216 = vperm.xlu0 %504, %v206_v16  }
  0x17   :  { %231 = vperm.xlu1 %505, %v209_v19  }
  0x18   :  { %226 = vperm.xlu0 %504, %v208_v18  }
  0x1b   :  { %241 = vperm.xlu1 %505, %v211_v21  }
  0x1c   :  { %236 = vperm.xlu0 %504, %v210_v20  }
  0x1f   :  { %251 = vperm.xlu1 %505, %v213_v23  }
  0x20   :  { %246 = vperm.xlu0 %504, %v212_v22  }
  0x82   :  { %v61_v26 = vpop.permute.xlu1 %60 }
  0x83   :  { %v51_v25 = vpop.permute.xlu0 %50 }
  0x86   :  { %v66_v28 = vpop.permute.xlu1 %65 }
  0x87   :  { %v56_v27 = vpop.permute.xlu0 %55 }
  0x8a   :  { %v76_v37 = vpop.permute.xlu1 %75 }
  0x8b   :  { %v71_v32 = vpop.permute.xlu0 %70 }
  0x8e   :  { %v86_v49 = vpop.permute.xlu1 %85 }
  0x8f   :  { %v81_v44 = vpop.permute.xlu0 %80 }
  0x92   :  { %v222_v2 = vpop.permute.xlu1 %221 }
  0x93   :  { %v217_v1 = vpop.permute.xlu0 %216 }
  0x96   :  { %v232_v4 = vpop.permute.xlu1 %231 }
  0x97   :  { %v227_v3 = vpop.permute.xlu0 %226 }
  0x9a   :  { %v242_v13 = vpop.permute.xlu1 %241 }
  0x9b   :  { %v237_v8 = vpop.permute.xlu0 %236 }
  0x9f   :  { %v247_v20 = vpop.permute.xlu0 %246 }
  0xdb   :  { %v466_v29 = vpop.f32.mrb[0].mxu0 }
  0xdc   :  { %v164_v30 = vadd.f32 %v466_v29, %v61_v26  ;;  %v155_v31 = vpop.f32.mrb[1].mxu0 }
  0xdd   :  { %v156_v33 = vadd.f32 %v155_v31, %v51_v25  ;;  %v467_v34 = vpop.f32.mrb[2].mxu0  ;;  %v252_v25 = vpop.permute.xlu1 %251 }
  0xde   :  { %v167_v35 = vadd.f32 %v467_v34, %v66_v28  ;;  %v158_v36 = vpop.f32.mrb[3].mxu0  ;;  %v188_v39 = vmax.f32 %v164_v30, 0.0 }
  0xdf   :  { %v159_v38 = vadd.f32 %v158_v36, %v56_v27  ;;  %v186_v41 = vmax.f32 %v156_v33, 0.0 }
  0xe0   :  { %v189_v40 = vmax.f32 %v167_v35, 0.0 }
  0xe1   :  { %v187_v42 = vmax.f32 %v159_v38, 0.0  ;;  %v409_v38 = vstv %s693_s6 }
  0xe2   :  { %v203_v43 = vpack.c.bf16 %v189_v40, %v188_v39 }
  0xe3   :  { %v470_v45 = vpop.f32.mrb[4].mxu0  ;;  %v202_v46 = vpack.c.bf16 %v187_v42, %v186_v41 }
  0xe4   :  { %v180_v47 = vadd.f32 %v470_v45, %v81_v44  ;;  %v171_v48 = vpop.f32.mrb[5].mxu0 }
  0xe5   :  { %v172_v50 = vadd.f32 %v171_v48, %v71_v32  ;;  %v471_v51 = vpop.f32.mrb[6].mxu0  ;;  %472 = vmatprep.subr.bf16.mxu1 %v202_v46 }
  0xe6   :  { %v183_v52 = vadd.f32 %v471_v51, %v86_v49  ;;  %v174_v53 = vpop.f32.mrb[7].mxu0  ;;  %473 = vmatpush3.bf16.msra.mxu1 %v202_v46  ;;  %v192_v55 = vmax.f32 %v180_v47, 0.0 }
  0xe7   :  { %v175_v54 = vadd.f32 %v174_v53, %v76_v37  ;;  %474 = vmatprep.subr.bf16.mxu1 %v203_v43  ;;  %v190_v57 = vmax.f32 %v172_v50, 0.0  ;;  %v360_v37 = vld [vmem:[%s692_s5] sm:$0xf] }
  0xe8   :  { %v193_v56 = vmax.f32 %v183_v52, 0.0 }
  0xe9   :  { %v191_v58 = vmax.f32 %v175_v54, 0.0 }
  0xea   :  { %v205_v59 = vpack.c.bf16 %v193_v56, %v192_v55  ;;  %475 = vmatpush3.bf16.msra.mxu1 %v203_v43 }
  0xeb   :  { %v204_v60 = vpack.c.bf16 %v191_v58, %v190_v57 }
  0xed   :  { %476 = vmatprep.subr.bf16.mxu1 %v204_v60 }
  0xee   :  { %477 = vmatpush3.bf16.msra.mxu1 %v204_v60 }
  0xef   :  { %478 = vmatprep.subr.bf16.mxu1 %v205_v59 }
  0xf2   :  { %479 = vmatpush3.bf16.msra.mxu1 %v205_v59 }
  0xf5   :  { %481 = vmatmul.mubr.msk.bf16.vlgmr.msra.gmra.mrb[0].mxu1 %vm274_vm1, %v511_v61 }
  0xf6   :  { %484 = vmatprep.mubr.msk.bf16.mxu1 %vm274_vm1, %v512_v62 }
  0xfd   :  { %485 = vmatmul.mubr.msk.bf16.gmra.mrb[4].mxu1 %vm274_vm1, %v513_v63 }
 0x1c8   :  { %v482_v5 = vpop.f32.mrb[0].mxu1 }
 0x1c9   :  { %v330_v6 = vadd.f32 %v482_v5, %v227_v3  ;;  %v321_v7 = vpop.f32.mrb[1].mxu1 }
 0x1ca   :  { %v322_v9 = vadd.f32 %v321_v7, %v217_v1  ;;  %v483_v10 = vpop.f32.mrb[2].mxu1 }
 0x1cb   :  { %v333_v11 = vadd.f32 %v483_v10, %v232_v4  ;;  %v324_v12 = vpop.f32.mrb[3].mxu1  ;;  %v354_v15 = vmax.f32 %v330_v6, 0.0 }
 0x1cc   :  { %v325_v14 = vadd.f32 %v324_v12, %v222_v2  ;;  %v352_v17 = vmax.f32 %v322_v9, 0.0 }
 0x1cd   :  { %v355_v16 = vmax.f32 %v333_v11, 0.0 }
 0x1ce   :  { %v353_v18 = vmax.f32 %v325_v14, 0.0 }
 0x1cf   :  { %v362_v19 = vpack.c.bf16 %v355_v16, %v354_v15 }
 0x1d0   :  { %v361_v21 = vpack.c.bf16 %v353_v18, %v352_v17  ;;  %v486_v22 = vpop.f32.mrb[4].mxu1 }
 0x1d1   :  { %v346_v23 = vadd.f32 %v486_v22, %v247_v20  ;;  %v337_v24 = vpop.f32.mrb[5].mxu1 }
 0x1d2   :  { %v338_v26 = vadd.f32 %v337_v24, %v237_v8  ;;  %v487_v27 = vpop.f32.mrb[6].mxu1  ;;  %489 = vmatpush3.bf16.msra.mxu0 %v361_v21 }
 0x1d3   :  { %v349_v28 = vadd.f32 %v487_v27, %v252_v25  ;;  %v340_v29 = vpop.f32.mrb[7].mxu1  ;;  %490 = vmatprep.subr.bf16.mxu0 %v539_v0  ;;  %v358_v31 = vmax.f32 %v346_v23, 0.0 }
 0x1d4   :  { %v341_v30 = vadd.f32 %v340_v29, %v242_v13  ;;  %v356_v33 = vmax.f32 %v338_v26, 0.0 }
 0x1d5   :  { %v359_v32 = vmax.f32 %v349_v28, 0.0 }
 0x1d6   :  { %v357_v34 = vmax.f32 %v341_v30, 0.0  ;;  %491 = vmatpush3.bf16.msra.mxu0 %v362_v19 }
 0x1d7   :  { %v364_v35 = vpack.c.bf16 %v359_v32, %v358_v31  ;;  %492 = vmatprep.subr.bf16.mxu0 %v539_v0 }
 0x1d8   :  { %v363_v36 = vpack.c.bf16 %v357_v34, %v356_v33 }
 0x1da   :  { %493 = vmatpush3.bf16.msra.mxu0 %v363_v36 }
 0x1db   :  { %494 = vmatprep.subr.bf16.mxu0 %v539_v0 }
 0x1de   :  { %495 = vmatpush3.bf16.msra.mxu0 %v364_v35 }
 0x1e1   :  { %497 = vmatmul.mubr.msk.bf16.vlgmr.msra.gmra.mrb[8].mxu0 %vm274_vm1, %v360_v37 }
 0x2b4   :  { %v402_v39 = vpop.f32.mrb[8].mxu0 }
 0x2b5   :  { %v410_v40 = vadd.f32 %v409_v38, %v402_v39  ;;  %v498_v41 = vpop.f32.mrb[9].mxu0 }
 0x2b6   :  { %v405_v42 = vpop.f32.mrb[10].mxu0 }
 0x2b7   :  { %v499_v43 = vpop.f32.mrb[11].mxu0  ;;  %412 = vst.msk [vmem:[#allocation3] sm:$0x1] %vm411_vm3, %v410_v40 }
 0x2b8   :  { %525 = shalt.err (!%p522_p4)
}
 0x2b9   :  { %s526_s8 = scalar_lea.hbm %s694_s7, 16 }
 0x2ba   :  { %p527_p5 = scmp.ne.s32.totalorder %s694_s7, %s526_s8  ;;  %p530_p6 = scmp.lt.u32.totalorder %s526_s8, %s694_s7 }
 0x2bc   :  { %p532_p7 = pnand %p530_p6, %p527_p5 }
 0x2be   :  { %535 = shalt.err (!%p532_p7)
}
 0x2bf   :  { %422 = dma.vmem_to_hbm [thread:$0]  %s420_s28, 16, %s694_s7, [#allocation4]  }
 0x2c0   :  { %536 = dma.done.wait [#allocation4], 16  }
 0x2c1   :  { %537 = vsyncadd [#allocation4], 4294967280 }
 0x2c2   :  { %426 = vsyncpa [#allocation4], 1 }

</bundles_post_ra>
